<compile_context>
chip_gen: v5e
topology: v5e:2x2
jax: 0.10.0
libtpu: 0.0.40
codegen_flags: <defaults>
</compile_context>

<pallas_src>
import jax
import jax.numpy as jnp
from jax.experimental import pallas as pl
from jax.experimental.pallas import tpu as pltpu

LANE = 128  # lane-dense output width


def subset_wrapper_kernel(x_ref, w_ref, b_ref, o_ref):
    # x_ref: (TB, C, HW)  NCHW-flattened batch tile (HW on lanes, C on sublanes)
    # w_ref: (C, LANE)    pre-gathered perm subset, pre-scaled by 1/HW, zero-padded
    # b_ref: (1, LANE)    pre-gathered bias, zero-padded
    # o_ref: (TB, LANE)   lane-dense output tile
    feat = jnp.sum(x_ref[...], axis=-1, dtype=jnp.float32)       # (TB, C), f32 accum
    out = jnp.dot(feat, w_ref[...],
                  preferred_element_type=jnp.float32) + b_ref[...]
    o_ref[...] = out.astype(o_ref.dtype)


def _round_up(v, m):
    return ((v + m - 1) // m) * m


def _tpu_generation():
    try:
        kind = jax.devices()[0].device_kind.lower()
    except Exception:
        kind = ""
    if "v7" in kind:
        return 7
    if "v6" in kind:
        return 6
    if "v5" in kind:
        return 5
    return 0


def imagenet_subset_forward(x_nchw, w, b, perm, num_classes, *, block_b=None):
    """x_nchw: (B, C, H, W) f32 or bf16. Returns (B, num_classes) f32."""
    B, C, H, W = x_nchw.shape
    HW = H * W

    # --- host-side glue (free reshape + constant folding, no extra HBM pass) ---
    x_flat = x_nchw.reshape(B, C, HW)                             # NO transpose

    # Fold perm-subset gather and the 1/HW mean scale into the weight; gather bias.
    idx = perm[:num_classes]
    w_sel = (w[:, idx].astype(jnp.float32)) * (1.0 / HW)          # (C, num_classes)
    b_sel = b[idx].astype(jnp.float32)                            # (num_classes,)
    w_pad = jnp.zeros((C, LANE), jnp.float32).at[:, :num_classes].set(w_sel)
    b_pad = jnp.zeros((1, LANE), jnp.float32).at[:, :num_classes].set(b_sel)

    # --- tile sizing from the PADDED VMEM footprint (double-buffered) ----------
    itemsize = jnp.dtype(x_flat.dtype).itemsize
    sublane_mult = {4: 8, 2: 16, 1: 32}.get(itemsize, 8)
    row_bytes_padded = _round_up(C, sublane_mult) * _round_up(HW, LANE) * itemsize

    gen = _tpu_generation()
    if gen >= 7:      # 64 MiB VMEM, ~3.2 TB/s HBM, 2 TCs -> keep tiles moderate, split batch
        budget, vmem_limit, want_split = 10 << 20, 48 << 20, True
    elif gen == 6:    # 128 MiB VMEM, ~1.4 TB/s HBM -> big tiles
        budget, vmem_limit, want_split = 14 << 20, 100 << 20, False
    elif gen == 5:    # 128 MiB VMEM but 16 MiB default scoped -> raise limit explicitly
        budget, vmem_limit, want_split = 8 << 20, 48 << 20, False
    else:
        budget, vmem_limit, want_split = 8 << 20, 64 << 20, False

    if block_b is None:
        block_b = max(1, budget // row_bytes_padded)
    block_b = int(min(block_b, B))
    if want_split and B > 8:
        # ensure grid_b >= 2 so the "parallel" batch axis spans both v7x TCs
        block_b = min(block_b, _round_up(pl.cdiv(B, 2), 8))
    if block_b < B:
        # keep output sublane dim (8,128)-legal when actually tiling
        block_b = max(8, (block_b // 8) * 8)
    grid_b = pl.cdiv(B, block_b)
    B_pad = grid_b * block_b
    if B_pad != B:
        x_flat = jnp.pad(x_flat, ((0, B_pad - B), (0, 0), (0, 0)))

    # make sure the scoped-VMEM limit covers the real (padded, double-buffered) footprint
    vmem_needed = (2 * block_b * row_bytes_padded            # x (double-buffered)
                   + 2 * block_b * LANE * 4                  # out (double-buffered)
                   + _round_up(C, 8) * LANE * 4 * 2          # weight
                   + 8 * LANE * 4 * 2                        # bias
                   + (1 << 20))                              # slack
    vmem_limit = int(max(vmem_limit, vmem_needed))

    out = pl.pallas_call(
        subset_wrapper_kernel,
        out_shape=jax.ShapeDtypeStruct((B_pad, LANE), jnp.float32),
        grid=(grid_b,),
        in_specs=[
            pl.BlockSpec((block_b, C, HW), lambda i: (i, 0, 0)),   # x tile (streamed)
            pl.BlockSpec((C, LANE), lambda i: (0, 0)),             # weight (resident)
            pl.BlockSpec((1, LANE), lambda i: (0, 0)),             # bias (resident)
        ],
        out_specs=pl.BlockSpec((block_b, LANE), lambda i: (i, 0)),
        compiler_params=pltpu.CompilerParams(
            dimension_semantics=("parallel",),                     # v7x: shard over 2 TCs
            vmem_limit_bytes=vmem_limit,
        ),
        cost_estimate=pl.CostEstimate(
            flops=B_pad * C * HW + 2 * B_pad * C * LANE,
            transcendentals=0,
            bytes_accessed=(B_pad * C * HW * itemsize
                            + B_pad * LANE * 4
                            + w_pad.size * 4 + b_pad.size * 4),
        ),
    )(x_flat, w_pad, b_pad)

    return out[:B, :num_classes]


def calculate_permutation_synthetic(num_classes, num_super_classes):
    """Deterministic stand-in for the directory-based permutation.

    Mirrors ImagenetSubsetWrapper.calculate_permutation: first `num_classes`
    entries map subset classes to super-class indices, remaining indices appended.
    """
    # TODO(synk): original reads class-folder names from disk; synthesized here.
    subset_to_super = [(3 * i + 5) % num_super_classes for i in range(num_classes)]
    remaining = sorted(set(range(num_super_classes)) - set(subset_to_super))
    return jnp.asarray(subset_to_super + remaining, dtype=jnp.int32)


if __name__ == "__main__":
    key = jax.random.PRNGKey(0)
    B, C, H, W = 2, 4, 16, 16
    NUM_SUPER = 16      # classes the inner "imagenet" network was trained on
    NUM_CLASSES = 8     # subset size

    kx, kw, kb = jax.random.split(key, 3)
    x = jax.random.normal(kx, (B, C, H, W), dtype=jnp.float32)
    w = jax.random.normal(kw, (C, NUM_SUPER), dtype=jnp.float32) * 0.1
    b = jax.random.normal(kb, (NUM_SUPER,), dtype=jnp.float32) * 0.1

    perm = calculate_permutation_synthetic(NUM_CLASSES, NUM_SUPER)

    # --- f32 path -----------------------------------------------------------
    out = imagenet_subset_forward(x, w, b, perm, NUM_CLASSES)
    out = jax.block_until_ready(out)

    feat_ref = jnp.mean(x, axis=(2, 3))
    logits_ref = feat_ref @ w + b
    ref = logits_ref[..., perm[:NUM_CLASSES]]
    assert out.shape == (B, NUM_CLASSES)
    assert jnp.allclose(out, ref, atol=1e-5, rtol=1e-5)

    # --- bf16 activation path (f32 accumulation inside the kernel) ----------
    x_bf = x.astype(jnp.bfloat16)
    out_bf = jax.block_until_ready(
        imagenet_subset_forward(x_bf, w, b, perm, NUM_CLASSES))
    feat_bf_ref = jnp.mean(x_bf.astype(jnp.float32), axis=(2, 3))
    ref_bf = (feat_bf_ref @ w + b)[..., perm[:NUM_CLASSES]]
    assert out_bf.shape == (B, NUM_CLASSES)
    assert jnp.allclose(out_bf, ref_bf, atol=2e-2, rtol=2e-2)

    print("KERNEL_OK")
</pallas_src>

<mosaic_0001>
module attributes {stable_mosaic.version = 11 : i64} {
  func.func @subset_wrapper_kernel(%arg0: i32, %arg1: memref<2x4x256xf32, #tpu.memory_space<vmem>>, %arg2: memref<4x128xf32, #tpu.memory_space<vmem>>, %arg3: memref<1x128xf32, #tpu.memory_space<vmem>>, %arg4: memref<2x128xf32, #tpu.memory_space<vmem>>) attributes {dimension_semantics = [#tpu.dimension_semantics<parallel>], iteration_bounds = array<i64: 1>, scalar_prefetch = 0 : i64, scratch_operands = 0 : i64, tpu.core_type = #tpu.core_type<tc>, window_params = [{transform_indices = @transform_0, window_bounds = array<i64: 2, 4, 256>}, {pipeline_mode = #tpu.pipeline_mode<synchronous>, transform_indices = @transform_1, window_bounds = array<i64: 4, 128>}, {pipeline_mode = #tpu.pipeline_mode<synchronous>, transform_indices = @transform_2, window_bounds = array<i64: 1, 128>}, {transform_indices = @transform_3, window_bounds = array<i64: 2, 128>}]} {
    %c0 = arith.constant 0 : index
    %c0_0 = arith.constant 0 : index
    %c0_1 = arith.constant 0 : index
    %0 = vector.load %arg1[%c0, %c0_0, %c0_1] : memref<2x4x256xf32, #tpu.memory_space<vmem>>, vector<2x4x256xf32>
    %cst = arith.constant dense<0.000000e+00> : vector<2x4xf32>
    %1 = vector.multi_reduction <add>, %0, %cst [2] : vector<2x4x256xf32> to vector<2x4xf32>
    %c0_2 = arith.constant 0 : index
    %c0_3 = arith.constant 0 : index
    %2 = vector.load %arg2[%c0_2, %c0_3] : memref<4x128xf32, #tpu.memory_space<vmem>>, vector<4x128xf32>
    %cst_4 = arith.constant dense<0.000000e+00> : vector<2x128xf32>
    %3 = tpu.matmul %1, %2, %cst_4 {dimension_numbers = #tpu.dot_dimension_numbers<[1], [0], [0], [1], [0, 0, 1, 1], [], []>} : vector<2x4xf32>, vector<4x128xf32>, vector<2x128xf32> -> vector<2x128xf32>
    %c0_5 = arith.constant 0 : index
    %c0_6 = arith.constant 0 : index
    %4 = vector.load %arg3[%c0_5, %c0_6] : memref<1x128xf32, #tpu.memory_space<vmem>>, vector<1x128xf32>
    %5 = vector.broadcast %4 : vector<1x128xf32> to vector<2x128xf32>
    %6 = arith.addf %3, %5 : vector<2x128xf32>
    %c0_7 = arith.constant 0 : index
    %c0_8 = arith.constant 0 : index
    %7 = vector.load %arg4[%c0_7, %c0_8] : memref<2x128xf32, #tpu.memory_space<vmem>>, vector<2x128xf32>
    tpu.vector_store %arg4[%c0_7, %c0_8], %6 {strides = array<i32>} : memref<2x128xf32, #tpu.memory_space<vmem>>, vector<2x128xf32>,
    return
  }
  func.func @transform_0(%arg0: i32) -> (i32, i32, i32) {
    %c0_i32 = arith.constant 0 : i32
    %c0_i32_0 = arith.constant 0 : i32
    %c0_i32_1 = arith.constant 0 : i32
    return %arg0, %c0_i32, %c0_i32_0 : i32, i32, i32
  }
  func.func @transform_1(%arg0: i32) -> (i32, i32) {
    %c0_i32 = arith.constant 0 : i32
    %c0_i32_0 = arith.constant 0 : i32
    %c0_i32_1 = arith.constant 0 : i32
    return %c0_i32, %c0_i32_0 : i32, i32
  }
  func.func @transform_2(%arg0: i32) -> (i32, i32) {
    %c0_i32 = arith.constant 0 : i32
    %c0_i32_0 = arith.constant 0 : i32
    %c0_i32_1 = arith.constant 0 : i32
    return %c0_i32, %c0_i32_0 : i32, i32
  }
  func.func @transform_3(%arg0: i32) -> (i32, i32) {
    %c0_i32 = arith.constant 0 : i32
    %c0_i32_0 = arith.constant 0 : i32
    return %arg0, %c0_i32 : i32, i32
  }
}

</mosaic_0001>

<bundles_post_ra>
// kernel: tpu_custom_call.1
= control target key start
LH: loop header
LB: loop body
LE: loop exit
PB: predicated region body
PF: predicated region fallthrough
CT: control target
= control target key end

     0   :  { %8 = vsyncpa [#allocation3], 0  ;;  %s252_s0 = inlined_call_operand.hbm [shape: f32[2,4,256], index: 0, kind: input, shape index: {}]   ;;  %s253_s1 = inlined_call_operand.hbm [shape: f32[4,128], index: 1, kind: input, shape index: {}]   ;;  %s254_s2 = inlined_call_operand.vmem [shape: f32[1,128], index: 2, kind: input, shape index: {}]   ;;  %s255_s3 = inlined_call_operand.hbm [shape: f32[2,128], index: 3, kind: output, shape index: {}]  }
   0x1   :  { %9 = vsyncpa [#allocation6], 0 }
   0x2   :  { %10 = vsyncpa [#allocation4], 0  ;;  %s15_s14 = sshll.u32 %s252_s0, 4  ;;  %s215_s15 = smov [#allocation2]   ;;  %s16_s14 = int_to_ptr.hbm [resolvable:$true] %s15_s14 }
   0x3   :  { %s17_s16 = sshll.u32 %s215_s15, 4  ;;  %s29_s19 = sshll.u32 %s253_s1, 4  ;;  %s18_s16 = int_to_ptr.vmem [resolvable:$true] %s17_s16  ;;  %s30_s19 = int_to_ptr.hbm [resolvable:$true] %s29_s19 }
   0x4   :  { %s216_s20 = smov 128   ;;  %s217_s21 = smov 8  }
   0x5   :  { %23 = dma.hbm_to_vmem [thread:$0]  %s16_s14, 256, %s18_s16, [#allocation3], %s216_s20, %s216_s20, %s217_s21  }
   0x6   :  { %s218_s22 = smov [#allocation5]  }
   0x7   :  { %s31_s23 = sshll.u32 %s218_s22, 4  ;;  %s32_s23 = int_to_ptr.vmem [resolvable:$true] %s31_s23 }
   0x8   :  { %34 = dma.hbm_to_vmem [thread:$0]  %s30_s19, 64, %s32_s23, [#allocation6]  }
   0x9   :  { %209 = dma.done.wait [#allocation3], 256  }
   0xa   :  { %210 = vsyncadd [#allocation3], 4294967040 }
   0xb   :  { %211 = dma.done.wait [#allocation6], 64  }
   0xc   :  { %212 = vsyncadd [#allocation6], 4294967232  ;;  %v45_v0 = vld [vmem:[#allocation2] sm:$0xff]  ;;  %v46_v1 = vld [vmem:[#allocation2 + $0x8] sm:$0xff]  ;;  %vm60_vm0 = vcmask 1043456   ;;  %v78_v14 = vlaneseq  ;;  %vm82_vm1 = vcmask 1041409  }
   0xd   :  { %49 = vst [vmem:[#allocation1] ss:$2 sm:$0xff] %v45_v0  ;;  %v71_v12 = vld [vmem:[#allocation5] sm:$0xf]  ;;  %vm84_vm2 = vcmask 31744   ;;  %s219_s24 = smov [#allocation7]  }
   0xe   :  { %53 = vst [vmem:[#allocation1 + $0x10] ss:$2 sm:$0xff] %v46_v1  ;;  %129 = vmatpush.msk.msra.mxu0 %vm60_vm0, %v71_v12  ;;  %v79_v15 = vand.u32 127, %v78_v14  ;;  %v136_v20 = vld [vmem:[%s254_s2] ss:$0 sm:$0xff]  ;;  %s116_s25 = sshll.u32 %s219_s24, 4  ;;  %s117_s25 = int_to_ptr.vmem [resolvable:$true] %s116_s25 }
   0xf   :  { %s118_s28 = sshll.u32 %s255_s3, 4  ;;  %s119_s28 = int_to_ptr.hbm [resolvable:$true] %s118_s28 }
  0x14   :  { %v50_v2 = vld.sshfl [vmem:[#allocation1] sm:$0xff pattern:$0x75316420]  ;;  %v51_v3 = vld.sshfl [vmem:[#allocation1 + $0x8] sm:$0xff pattern:$0x75316420] }
  0x15   :  { %v61_v4 = vsel %vm60_vm0, %v50_v2, 0.0  ;;  %v62_v5 = vsel %vm60_vm0, %v51_v3, 0.0  ;;  %v54_v7 = vld.sshfl [vmem:[#allocation1 + $0x10] sm:$0xff pattern:$0x75316420] }
  0x16   :  { %v63_v6 = vadd.f32 %v62_v5, %v61_v4  ;;  %v55_v8 = vld.sshfl [vmem:[#allocation1 + $0x18] sm:$0xff pattern:$0x75316420]  ;;  %v66_v9 = vsel %vm60_vm0, %v54_v7, 0.0 }
  0x17   :  { %v67_v10 = vsel %vm60_vm0, %v55_v8, 0.0 }
  0x18   :  { %64 = vadd.xlane.f32.xlu0 %v63_v6  ;;  %v68_v11 = vadd.f32 %v67_v10, %v66_v9 }
  0x20   :  { %69 = vadd.xlane.f32.xlu0 %v68_v11 }
  0x8b   :  { %v65_v13 = vpop.xlane.xlu0 %64 }
  0x8c   :  { %v80_v17 = vperm.slane %v65_v13, %v79_v15 }
  0x93   :  { %v70_v16 = vpop.xlane.xlu0 %69 }
  0x94   :  { %v81_v18 = vperm.slane %v70_v16, %v79_v15 }
  0x96   :  { %v83_v19 = vsel %vm82_vm1, %v81_v18, %v80_v17 }
  0x97   :  { %130 = vmatmul.msk.f32.vlgmr.msra.gmra.mxu0 %vm84_vm2, %v83_v19 }
 0x114   :  { %v107_v21 = vpop.f32.mrf.mxu0 }
 0x115   :  { %v108_v22 = vadd.f32 %v136_v20, %v107_v21 }
 0x117   :  { %110 = vst [vmem:[#allocation7] sm:$0x3] %v108_v22 }
 0x118   :  { %121 = dma.vmem_to_hbm [thread:$0]  %s117_s25, 32, %s119_s28, [#allocation4]  }
 0x119   :  { %213 = dma.done.wait [#allocation4], 32  }
 0x11a   :  { %214 = vsyncadd [#allocation4], 4294967264 }
 0x11b   :  { %126 = vsyncpa [#allocation3], 1 }
 0x11c   :  { %127 = vsyncpa [#allocation6], 1 }
 0x11d   :  { %128 = vsyncpa [#allocation4], 1 }

</bundles_post_ra>
